<compile_context>
chip_gen: v6e
topology: v6e:2x2x1
jax: 0.10.0
libtpu: 0.0.40
codegen_flags: <defaults>
</compile_context>

<pallas_src>
import jax
import jax.numpy as jnp
from jax.experimental import pallas as pl
from jax.experimental.pallas import tpu as pltpu


def _round_up(n: int, m: int) -> int:
    return ((n + m - 1) // m) * m


def _vmem_capacity_bytes() -> int:
    try:
        return int(pltpu.get_tpu_info().vmem_capacity_bytes)
    except Exception:
        return 64 * 1024 * 1024  # conservative: v7x per-TensorCore VMEM


def _plan_tiles(B: int, Dp: int, ZP: int):
    """Pick the batch tile TB and a scoped-VMEM limit sized to the working set."""
    cap = _vmem_capacity_bytes()
    budget = int(cap * 0.7)
    # Resident weights/biases (default 2-deep pipelining keeps two copies).
    weight_bytes = 2 * ((Dp * 2 * ZP + ZP * Dp) * 2 + (2 * ZP + Dp) * 4)
    # Per-batch-row streaming bytes, 2 buffers each:
    #   x bf16 in, eps f32 in, [qz_m|qz_v|z] f32 out, px f32 out, stats f32 out (128).
    per_row = 2 * (Dp * 2 + ZP * 4 + 3 * ZP * 4 + Dp * 4 + 128 * 4)

    tb = 256
    while tb > 32 and weight_bytes + tb * per_row > budget:
        tb //= 2
    # v7x has 2 TensorCores: keep >= 2 grid steps whenever the batch can be split.
    if _round_up(B, tb) // tb < 2 and B > tb // 2 and tb >= 64:
        tb //= 2
    # Small batches: pad rows up to a 128-row tile (MXU fill / bf16 sublane packing)
    # instead of collapsing to tiny M; never exceed what the padded batch needs.
    tb = min(tb, max(128, _round_up(B, 16)))
    tb = max(tb, 16)

    vmem_limit = int(min(cap, max((weight_bytes + tb * per_row) * 5 // 4 + (4 << 20),
                                  32 << 20)))
    return tb, vmem_limit


# ----------------------------- Pallas kernel --------------------------------
def _vae_forward_kernel(
    x_ref,                                      # [TB, Dp]   bf16 (streamed)
    eps_ref,                                    # [TB, ZP]   f32  (reparam noise)
    w_enc_ref,                                  # [Dp, 2*ZP] bf16 (mu || logvar, zero-padded)
    b_enc_ref,                                  # [1, 2*ZP]  f32
    w_dec_ref,                                  # [ZP, Dp]   bf16 (padded rows are zero)
    b_dec_ref,                                  # [1, Dp]    f32
    lat_ref,                                    # [TB, 3*ZP] f32  -> [qz_m | qz_v | z]
    px_ref,                                     # [TB, Dp]   f32
    stats_ref,                                  # [TB, 128]  f32  lane0=recon lane1=kl
):
    ZP = eps_ref.shape[-1]
    x_bf = x_ref[...]                           # bf16

    # inference(): fused encoder matmul -> [TB, 2*ZP]; f32 accumulation on the MXU.
    enc = jnp.dot(x_bf, w_enc_ref[...], preferred_element_type=jnp.float32)
    enc = enc + b_enc_ref[...]
    qz_m = enc[:, :ZP]
    qz_logv = enc[:, ZP:]

    # Reparameterization; std computed once (single EUP exp) and reused for the KL.
    std = jnp.exp(0.5 * qz_logv)
    var = std * std                             # == exp(qz_logv)
    z = qz_m + std * eps_ref[...]

    # generative(): linear decoder -> likelihood params.
    px = jnp.dot(z.astype(jnp.bfloat16), w_dec_ref[...],
                 preferred_element_type=jnp.float32)
    px = px + b_dec_ref[...]

    # Fused lane-dense latent slab: one output DMA per step instead of three.
    lat_ref[:, :ZP] = qz_m
    lat_ref[:, ZP:2 * ZP] = var
    lat_ref[:, 2 * ZP:3 * ZP] = z
    px_ref[...] = px

    # loss(): per-observation reconstruction + KL(q(z|x) || N(0, I)), in f32.
    # Zero-padded lanes contribute exactly zero: qz_m = qz_logv = 0 gives
    # 1 + 0 - 0 - exp(0) = 0, and padded x/px columns are both zero.
    diff = x_bf.astype(jnp.float32) - px
    recon = jnp.sum(diff * diff, axis=-1, keepdims=True)                   # [TB, 1]
    kl = -0.5 * jnp.sum(1.0 + qz_logv - qz_m * qz_m - var,
                        axis=-1, keepdims=True)                            # [TB, 1]

    # Pack both per-obs scalars into one lane-dense [TB, 128] slab
    # (lane 0 = recon, lane 1 = kl) so the store is a full-width unmasked vst.
    lane = jax.lax.broadcasted_iota(jnp.int32, stats_ref.shape, 1)
    stats_ref[...] = jnp.where(lane == 0, recon, jnp.where(lane == 1, kl, 0.0))


def vae_forward_pallas(x, eps, w_enc, b_enc, w_dec, b_dec, *, n_latent):
    """Fused VAE forward. Returns (qz_m, qz_v, z, px, recon_per_obs, kl_per_obs)."""
    B, D = x.shape
    Dp = w_enc.shape[0]            # n_input rounded up to a multiple of 128 lanes
    ZP = w_dec.shape[0]            # n_latent rounded up to a multiple of 128 lanes
    f32 = jnp.float32

    TB, vmem_limit = _plan_tiles(B, Dp, ZP)
    Bp = _round_up(B, TB)

    # Stream x in bf16: the kernel is HBM-bandwidth-bound and x-read / px-write dominate.
    x = x.astype(jnp.bfloat16)
    if (Bp, Dp) != (B, D):
        x = jnp.pad(x, ((0, Bp - B), (0, Dp - D)))
    eps = eps.astype(f32)
    if eps.shape != (Bp, ZP):
        eps = jnp.pad(eps, ((0, Bp - eps.shape[0]), (0, ZP - eps.shape[1])))

    grid = (Bp // TB,)
    batch_spec = lambda w: pl.BlockSpec((TB, w), lambda i: (i, 0))
    resident = lambda r, c: pl.BlockSpec((r, c), lambda i: (0, 0))  # VMEM-resident

    out_shapes = (
        jax.ShapeDtypeStruct((Bp, 3 * ZP), f32),    # [qz_m | qz_v | z]
        jax.ShapeDtypeStruct((Bp, Dp), f32),        # px
        jax.ShapeDtypeStruct((Bp, 128), f32),       # stats: lane 0 recon, lane 1 kl
    )

    lat, px, stats = pl.pallas_call(
        _vae_forward_kernel,
        out_shape=out_shapes,
        grid_spec=pltpu.PrefetchScalarGridSpec(
            num_scalar_prefetch=0,
            grid=grid,
            in_specs=[
                batch_spec(Dp),                 # x (bf16)
                batch_spec(ZP),                 # eps
                resident(Dp, 2 * ZP),           # fused encoder weight
                resident(1, 2 * ZP),            # fused encoder bias
                resident(ZP, Dp),               # decoder weight
                resident(1, Dp),                # decoder bias
            ],
            out_specs=[batch_spec(3 * ZP), batch_spec(Dp), batch_spec(128)],
        ),
        compiler_params=pltpu.CompilerParams(
            dimension_semantics=("parallel",),
            vmem_limit_bytes=vmem_limit,
        ),
    )(x, eps, w_enc, b_enc, w_dec, b_dec)

    qz_m = lat[:B, :n_latent]
    qz_v = lat[:B, ZP:ZP + n_latent]
    z = lat[:B, 2 * ZP:2 * ZP + n_latent]
    return qz_m, qz_v, z, px[:B, :D], stats[:B, 0], stats[:B, 1]


# --------------------- BaseModuleClass orchestration ------------------------
def _get_dict_if_none(param):
    return {} if not isinstance(param, dict) else param


class LossRecorder:
    """JAX mirror of the PyTorch LossRecorder."""

    def __init__(self, loss, reconstruction_loss=jnp.zeros((1,)),
                 kl_local=jnp.zeros((1,)), kl_global=jnp.zeros((1,)), **kwargs):
        self._loss = loss if isinstance(loss, dict) else dict(loss=loss)
        self._reconstruction_loss = (reconstruction_loss if isinstance(reconstruction_loss, dict)
                                     else dict(reconstruction_loss=reconstruction_loss))
        self._kl_local = kl_local if isinstance(kl_local, dict) else dict(kl_local=kl_local)
        self._kl_global = kl_global if isinstance(kl_global, dict) else dict(kl_global=kl_global)
        for key, value in kwargs.items():
            setattr(self, key, value)

    @staticmethod
    def _get_dict_sum(dictionary):
        total = 0.0
        for value in dictionary.values():
            total += value
        return total

    @property
    def loss(self):
        return self._get_dict_sum(self._loss)

    @property
    def reconstruction_loss(self):
        return self._get_dict_sum(self._reconstruction_loss)

    @property
    def kl_local(self):
        return self._get_dict_sum(self._kl_local)

    @property
    def kl_global(self):
        return self._get_dict_sum(self._kl_global)


class BaseModuleClassPallas:
    """Concrete JAX/Pallas instantiation of BaseModuleClass's forward orchestration."""
    # TODO(synk): auto_move_data (host-side torch device-transfer decorator) has no
    # kernel equivalent; JAX arrays are already device-resident.

    def __init__(self, n_input, n_latent, key):
        k1, k2, k3 = jax.random.split(key, 3)
        f32 = jnp.float32
        s_enc = 1.0 / jnp.sqrt(jnp.float32(n_input))
        s_dec = 1.0 / jnp.sqrt(jnp.float32(n_latent))
        Dp = _round_up(n_input, 128)
        ZP = _round_up(n_latent, 128)

        w_mu = jax.random.normal(k1, (n_input, n_latent), f32) * s_enc
        w_lv = jax.random.normal(k2, (n_input, n_latent), f32) * s_enc
        w_dec = jax.random.normal(k3, (n_latent, n_input), f32) * s_dec

        # Fuse mu/logvar encoder weights into one [Dp, 2*ZP] matrix and pad the
        # decoder to [ZP, Dp]; matmul operands stored in bf16, biases in f32.
        w_enc_p = jnp.zeros((Dp, 2 * ZP), f32)
        w_enc_p = w_enc_p.at[:n_input, :n_latent].set(w_mu)
        w_enc_p = w_enc_p.at[:n_input, ZP:ZP + n_latent].set(w_lv)
        w_dec_p = jnp.zeros((ZP, Dp), f32).at[:n_latent, :n_input].set(w_dec)

        self.params = {
            "w_enc": w_enc_p.astype(jnp.bfloat16),
            "b_enc": jnp.zeros((1, 2 * ZP), f32),
            "w_dec": w_dec_p.astype(jnp.bfloat16),
            "b_dec": jnp.zeros((1, Dp), f32),
        }
        self.n_input = n_input
        self.n_latent = n_latent
        self.Dp = Dp
        self.ZP = ZP

    # --- abstract methods, concretized ---
    def _get_inference_input(self, tensors):
        return dict(x=tensors["X"])

    def _get_generative_input(self, tensors, inference_outputs):
        return dict(z=inference_outputs["z"], px=inference_outputs["px"])

    def inference(self, x, rng_seed=0):
        # Pass a fresh rng_seed per training step; no mutable RNG state is kept here.
        key = jax.random.PRNGKey(int(rng_seed))
        eps = jax.random.normal(key, (x.shape[0], self.n_latent), jnp.float32)
        qz_m, qz_v, z, px, recon, kl = vae_forward_pallas(
            x, eps,
            self.params["w_enc"], self.params["b_enc"],
            self.params["w_dec"], self.params["b_dec"],
            n_latent=self.n_latent)
        return dict(qz_m=qz_m, qz_v=qz_v, z=z, px=px,
                    reconstruction_loss_obs=recon, kl_local_obs=kl)

    def generative(self, z, px):
        # Decoder is fused into the inference kernel; px is threaded through purely.
        return dict(px=px)

    def loss(self, tensors, inference_outputs, generative_outputs, kl_weight=1.0):
        recon = inference_outputs["reconstruction_loss_obs"]   # [B]
        kl_local = inference_outputs["kl_local_obs"]           # [B]
        total = jnp.mean(recon + kl_weight * kl_local)
        return LossRecorder(total, recon, kl_local, jnp.zeros((1,), jnp.float32))

    def sample(self):
        raise NotImplementedError

    # --- forward() orchestration, mirroring the PyTorch base class ---
    def forward(self, tensors,
                get_inference_input_kwargs=None, get_generative_input_kwargs=None,
                inference_kwargs=None, generative_kwargs=None, loss_kwargs=None,
                compute_loss=True):
        inference_kwargs = _get_dict_if_none(inference_kwargs)
        generative_kwargs = _get_dict_if_none(generative_kwargs)
        loss_kwargs = _get_dict_if_none(loss_kwargs)
        get_inference_input_kwargs = _get_dict_if_none(get_inference_input_kwargs)
        get_generative_input_kwargs = _get_dict_if_none(get_generative_input_kwargs)

        inference_inputs = self._get_inference_input(tensors, **get_inference_input_kwargs)
        inference_outputs = self.inference(**inference_inputs, **inference_kwargs)
        generative_inputs = self._get_generative_input(tensors, inference_outputs,
                                                       **get_generative_input_kwargs)
        generative_outputs = self.generative(**generative_inputs, **generative_kwargs)
        if compute_loss:
            losses = self.loss(tensors, inference_outputs, generative_outputs, **loss_kwargs)
            return inference_outputs, generative_outputs, losses
        return inference_outputs, generative_outputs


# --------------------------------- main --------------------------------------
if __name__ == "__main__":
    key = jax.random.PRNGKey(0)
    k_data, k_model = jax.random.split(key)

    batch, n_input, n_latent = 8, 128, 32
    x = jax.random.normal(k_data, (batch, n_input), jnp.float32)
    tensors = {"X": x}

    module = BaseModuleClassPallas(n_input=n_input, n_latent=n_latent, key=k_model)
    inference_outputs, generative_outputs, losses = module.forward(
        tensors, inference_kwargs={"rng_seed": 0})

    jax.block_until_ready((inference_outputs["qz_m"], inference_outputs["qz_v"],
                           inference_outputs["z"], generative_outputs["px"],
                           losses.loss, losses.reconstruction_loss, losses.kl_local))

    # shape checks
    assert inference_outputs["qz_m"].shape == (batch, n_latent)
    assert inference_outputs["qz_v"].shape == (batch, n_latent)
    assert inference_outputs["z"].shape == (batch, n_latent)
    assert generative_outputs["px"].shape == (batch, n_input)
    assert losses.reconstruction_loss.shape == (batch,)
    assert losses.kl_local.shape == (batch,)
    assert losses.loss.shape == ()
    assert bool(jnp.isfinite(losses.loss))

    # numerical check against a pure-JAX f32 reference (loose tolerances: matmul
    # operands are bf16 inside the kernel, accumulation is f32).
    ZP = module.ZP
    w_enc_f = module.params["w_enc"].astype(jnp.float32)
    w_dec_f = module.params["w_dec"].astype(jnp.float32)
    w_mu = w_enc_f[:n_input, :n_latent]
    w_lv = w_enc_f[:n_input, ZP:ZP + n_latent]
    w_de = w_dec_f[:n_latent, :n_input]
    eps_ref = jax.random.normal(jax.random.PRNGKey(0), (batch, n_latent), jnp.float32)

    qz_m_r = x @ w_mu
    qz_lv_r = x @ w_lv
    std_r = jnp.exp(0.5 * qz_lv_r)
    z_r = qz_m_r + std_r * eps_ref
    px_r = z_r @ w_de
    recon_r = jnp.sum((x - px_r) ** 2, axis=-1)
    kl_r = -0.5 * jnp.sum(1.0 + qz_lv_r - qz_m_r ** 2 - jnp.exp(qz_lv_r), axis=-1)

    assert bool(jnp.allclose(inference_outputs["qz_m"], qz_m_r, rtol=0.2, atol=0.5))
    assert bool(jnp.allclose(inference_outputs["qz_v"], std_r * std_r, rtol=0.2, atol=0.5))
    assert bool(jnp.allclose(inference_outputs["z"], z_r, rtol=0.2, atol=0.5))
    assert bool(jnp.allclose(generative_outputs["px"], px_r, rtol=0.2, atol=0.5))
    assert bool(jnp.allclose(losses.reconstruction_loss, recon_r, rtol=0.2, atol=2.0))
    assert bool(jnp.allclose(losses.kl_local, kl_r, rtol=0.2, atol=2.0))
    assert bool(jnp.allclose(losses.loss, jnp.mean(recon_r + kl_r), rtol=0.2, atol=2.0))

    print("KERNEL_OK")
</pallas_src>

<mosaic_0001>
module attributes {stable_mosaic.version = 11 : i64} {
  func.func @_vae_forward_kernel(%arg0: i32, %arg1: memref<128x128xbf16, #tpu.memory_space<vmem>>, %arg2: memref<128x128xf32, #tpu.memory_space<vmem>>, %arg3: memref<128x256xbf16, #tpu.memory_space<vmem>>, %arg4: memref<1x256xf32, #tpu.memory_space<vmem>>, %arg5: memref<128x128xbf16, #tpu.memory_space<vmem>>, %arg6: memref<1x128xf32, #tpu.memory_space<vmem>>, %arg7: memref<128x384xf32, #tpu.memory_space<vmem>>, %arg8: memref<128x128xf32, #tpu.memory_space<vmem>>, %arg9: memref<128x128xf32, #tpu.memory_space<vmem>>) attributes {dimension_semantics = [#tpu.dimension_semantics<parallel>], iteration_bounds = array<i64: 1>, scalar_prefetch = 0 : i64, scratch_operands = 0 : i64, tpu.core_type = #tpu.core_type<tc>, window_params = [{transform_indices = @transform_0, window_bounds = array<i64: 128, 128>}, {transform_indices = @transform_1, window_bounds = array<i64: 128, 128>}, {pipeline_mode = #tpu.pipeline_mode<synchronous>, transform_indices = @transform_2, window_bounds = array<i64: 128, 256>}, {pipeline_mode = #tpu.pipeline_mode<synchronous>, transform_indices = @transform_3, window_bounds = array<i64: 1, 256>}, {pipeline_mode = #tpu.pipeline_mode<synchronous>, transform_indices = @transform_4, window_bounds = array<i64: 128, 128>}, {pipeline_mode = #tpu.pipeline_mode<synchronous>, transform_indices = @transform_5, window_bounds = array<i64: 1, 128>}, {transform_indices = @transform_6, window_bounds = array<i64: 128, 384>}, {transform_indices = @transform_7, window_bounds = array<i64: 128, 128>}, {transform_indices = @transform_8, window_bounds = array<i64: 128, 128>}]} {
    %c0 = arith.constant 0 : index
    %c0_0 = arith.constant 0 : index
    %0 = vector.load %arg1[%c0, %c0_0] : memref<128x128xbf16, #tpu.memory_space<vmem>>, vector<128x128xbf16>
    %c0_1 = arith.constant 0 : index
    %c0_2 = arith.constant 0 : index
    %1 = vector.load %arg3[%c0_1, %c0_2] : memref<128x256xbf16, #tpu.memory_space<vmem>>, vector<128x256xbf16>
    %cst = arith.constant dense<0.000000e+00> : vector<128x256xf32>
    %2 = tpu.matmul %0, %1, %cst {dimension_numbers = #tpu.dot_dimension_numbers<[1], [0], [0], [1], [0, 0, 1, 1], [], []>} : vector<128x128xbf16>, vector<128x256xbf16>, vector<128x256xf32> -> vector<128x256xf32>
    %c0_3 = arith.constant 0 : index
    %c0_4 = arith.constant 0 : index
    %3 = vector.load %arg4[%c0_3, %c0_4] : memref<1x256xf32, #tpu.memory_space<vmem>>, vector<1x256xf32>
    %4 = vector.broadcast %3 : vector<1x256xf32> to vector<128x256xf32>
    %5 = arith.addf %2, %4 : vector<128x256xf32>
    %6 = vector.extract_strided_slice %5 {offsets = [0, 0], sizes = [128, 128], strides = [1, 1]} : vector<128x256xf32> to vector<128x128xf32>
    %7 = vector.extract_strided_slice %5 {offsets = [0, 128], sizes = [128, 128], strides = [1, 1]} : vector<128x256xf32> to vector<128x128xf32>
    %cst_5 = arith.constant 5.000000e-01 : f32
    %8 = vector.broadcast %cst_5 : f32 to vector<128x128xf32>
    %9 = arith.mulf %8, %7 : vector<128x128xf32>
    %10 = math.exp %9 : vector<128x128xf32>
    %11 = arith.mulf %10, %10 : vector<128x128xf32>
    %c0_6 = arith.constant 0 : index
    %c0_7 = arith.constant 0 : index
    %12 = vector.load %arg2[%c0_6, %c0_7] : memref<128x128xf32, #tpu.memory_space<vmem>>, vector<128x128xf32>
    %13 = arith.mulf %10, %12 : vector<128x128xf32>
    %14 = arith.addf %6, %13 : vector<128x128xf32>
    %15 = arith.truncf %14 : vector<128x128xf32> to vector<128x128xbf16>
    %c0_8 = arith.constant 0 : index
    %c0_9 = arith.constant 0 : index
    %16 = vector.load %arg5[%c0_8, %c0_9] : memref<128x128xbf16, #tpu.memory_space<vmem>>, vector<128x128xbf16>
    %cst_10 = arith.constant dense<0.000000e+00> : vector<128x128xf32>
    %17 = tpu.matmul %15, %16, %cst_10 {dimension_numbers = #tpu.dot_dimension_numbers<[1], [0], [0], [1], [0, 0, 1, 1], [], []>} : vector<128x128xbf16>, vector<128x128xbf16>, vector<128x128xf32> -> vector<128x128xf32>
    %c0_11 = arith.constant 0 : index
    %c0_12 = arith.constant 0 : index
    %18 = vector.load %arg6[%c0_11, %c0_12] : memref<1x128xf32, #tpu.memory_space<vmem>>, vector<1x128xf32>
    %19 = vector.broadcast %18 : vector<1x128xf32> to vector<128x128xf32>
    %20 = arith.addf %17, %19 : vector<128x128xf32>
    %c0_13 = arith.constant 0 : index
    %c0_14 = arith.constant 0 : index
    %21 = vector.load %arg7[%c0_13, %c0_14] : memref<128x384xf32, #tpu.memory_space<vmem>>, vector<128x128xf32>
    tpu.vector_store %arg7[%c0_13, %c0_14], %6 {strides = array<i32>} : memref<128x384xf32, #tpu.memory_space<vmem>>, vector<128x128xf32>,
    %c0_15 = arith.constant 0 : index
    %c128 = arith.constant 128 : index
    %22 = vector.load %arg7[%c0_15, %c128] : memref<128x384xf32, #tpu.memory_space<vmem>>, vector<128x128xf32>
    tpu.vector_store %arg7[%c0_15, %c128], %11 {strides = array<i32>} : memref<128x384xf32, #tpu.memory_space<vmem>>, vector<128x128xf32>,
    %c0_16 = arith.constant 0 : index
    %c256 = arith.constant 256 : index
    %23 = vector.load %arg7[%c0_16, %c256] : memref<128x384xf32, #tpu.memory_space<vmem>>, vector<128x128xf32>
    tpu.vector_store %arg7[%c0_16, %c256], %14 {strides = array<i32>} : memref<128x384xf32, #tpu.memory_space<vmem>>, vector<128x128xf32>,
    %c0_17 = arith.constant 0 : index
    %c0_18 = arith.constant 0 : index
    %24 = vector.load %arg8[%c0_17, %c0_18] : memref<128x128xf32, #tpu.memory_space<vmem>>, vector<128x128xf32>
    tpu.vector_store %arg8[%c0_17, %c0_18], %20 {strides = array<i32>} : memref<128x128xf32, #tpu.memory_space<vmem>>, vector<128x128xf32>,
    %25 = arith.extf %0 : vector<128x128xbf16> to vector<128x128xf32>
    %26 = arith.subf %25, %20 : vector<128x128xf32>
    %27 = arith.mulf %26, %26 : vector<128x128xf32>
    %cst_19 = arith.constant dense<0.000000e+00> : vector<128xf32>
    %28 = vector.multi_reduction <add>, %27, %cst_19 [1] : vector<128x128xf32> to vector<128xf32>
    %29 = vector.shape_cast %28 : vector<128xf32> to vector<128x1xf32>
    %cst_20 = arith.constant 1.000000e+00 : f32
    %30 = vector.broadcast %cst_20 : f32 to vector<128x128xf32>
    %31 = arith.addf %30, %7 : vector<128x128xf32>
    %32 = arith.mulf %6, %6 : vector<128x128xf32>
    %33 = arith.subf %31, %32 : vector<128x128xf32>
    %34 = arith.subf %33, %11 : vector<128x128xf32>
    %cst_21 = arith.constant dense<0.000000e+00> : vector<128xf32>
    %35 = vector.multi_reduction <add>, %34, %cst_21 [1] : vector<128x128xf32> to vector<128xf32>
    %36 = vector.shape_cast %35 : vector<128xf32> to vector<128x1xf32>
    %cst_22 = arith.constant -5.000000e-01 : f32
    %37 = vector.broadcast %cst_22 : f32 to vector<128x1xf32>
    %38 = arith.mulf %37, %36 : vector<128x1xf32>
    %39 = tpu.iota {dimensions = array<i32: 1>} : vector<128x128xi32>
    %c0_i32 = arith.constant 0 : i32
    %40 = vector.broadcast %c0_i32 : i32 to vector<128x128xi32>
    %41 = arith.cmpi eq, %39, %40 : vector<128x128xi32>
    %c1_i32 = arith.constant 1 : i32
    %42 = vector.broadcast %c1_i32 : i32 to vector<128x128xi32>
    %43 = arith.cmpi eq, %39, %42 : vector<128x128xi32>
    %cst_23 = arith.constant 0.000000e+00 : f32
    %44 = vector.shape_cast %38 : vector<128x1xf32> to vector<128x1xf32>
    %45 = vector.broadcast %44 : vector<128x1xf32> to vector<128x128xf32>
    %46 = vector.broadcast %cst_23 : f32 to vector<128x128xf32>
    %47 = arith.select %43, %45, %46 : vector<128x128xi1>, vector<128x128xf32>
    %48 = vector.shape_cast %29 : vector<128x1xf32> to vector<128x1xf32>
    %49 = vector.broadcast %48 : vector<128x1xf32> to vector<128x128xf32>
    %50 = arith.select %41, %49, %47 : vector<128x128xi1>, vector<128x128xf32>
    %c0_24 = arith.constant 0 : index
    %c0_25 = arith.constant 0 : index
    %51 = vector.load %arg9[%c0_24, %c0_25] : memref<128x128xf32, #tpu.memory_space<vmem>>, vector<128x128xf32>
    tpu.vector_store %arg9[%c0_24, %c0_25], %50 {strides = array<i32>} : memref<128x128xf32, #tpu.memory_space<vmem>>, vector<128x128xf32>,
    return
  }
  func.func @transform_0(%arg0: i32) -> (i32, i32) {
    %c0_i32 = arith.constant 0 : i32
    %c0_i32_0 = arith.constant 0 : i32
    return %arg0, %c0_i32 : i32, i32
  }
  func.func @transform_1(%arg0: i32) -> (i32, i32) {
    %c0_i32 = arith.constant 0 : i32
    %c0_i32_0 = arith.constant 0 : i32
    return %arg0, %c0_i32 : i32, i32
  }
  func.func @transform_2(%arg0: i32) -> (i32, i32) {
    %c0_i32 = arith.constant 0 : i32
    %c0_i32_0 = arith.constant 0 : i32
    %c0_i32_1 = arith.constant 0 : i32
    return %c0_i32, %c0_i32_0 : i32, i32
  }
  func.func @transform_3(%arg0: i32) -> (i32, i32) {
    %c0_i32 = arith.constant 0 : i32
    %c0_i32_0 = arith.constant 0 : i32
    %c0_i32_1 = arith.constant 0 : i32
    return %c0_i32, %c0_i32_0 : i32, i32
  }
  func.func @transform_4(%arg0: i32) -> (i32, i32) {
    %c0_i32 = arith.constant 0 : i32
    %c0_i32_0 = arith.constant 0 : i32
    %c0_i32_1 = arith.constant 0 : i32
    return %c0_i32, %c0_i32_0 : i32, i32
  }
  func.func @transform_5(%arg0: i32) -> (i32, i32) {
    %c0_i32 = arith.constant 0 : i32
    %c0_i32_0 = arith.constant 0 : i32
    %c0_i32_1 = arith.constant 0 : i32
    return %c0_i32, %c0_i32_0 : i32, i32
  }
  func.func @transform_6(%arg0: i32) -> (i32, i32) {
    %c0_i32 = arith.constant 0 : i32
    %c0_i32_0 = arith.constant 0 : i32
    return %arg0, %c0_i32 : i32, i32
  }
  func.func @transform_7(%arg0: i32) -> (i32, i32) {
    %c0_i32 = arith.constant 0 : i32
    %c0_i32_0 = arith.constant 0 : i32
    return %arg0, %c0_i32 : i32, i32
  }
  func.func @transform_8(%arg0: i32) -> (i32, i32) {
    %c0_i32 = arith.constant 0 : i32
    %c0_i32_0 = arith.constant 0 : i32
    return %arg0, %c0_i32 : i32, i32
  }
}

</mosaic_0001>

<bundles_post_ra>
// kernel: tpu_custom_call.1
= control target key start
LH: loop header
LB: loop body
LE: loop exit
PB: predicated region body
PF: predicated region fallthrough
CT: control target
= control target key end

     0   :  { %14 = vsyncpa [#allocation3], 0  ;;  %s1748_s0 = inlined_call_operand.hbm [shape: bf16[128,128], index: 0, kind: input, shape index: {}]   ;;  %s1749_s1 = inlined_call_operand.hbm [shape: f32[128,128], index: 1, kind: input, shape index: {}]   ;;  %s1750_s2 = inlined_call_operand.hbm [shape: bf16[128,256], index: 2, kind: input, shape index: {}]   ;;  %s1751_s3 = inlined_call_operand.vmem [shape: f32[1,256], index: 3, kind: input, shape index: {}]   ;;  %s1752_s4 = inlined_call_operand.hbm [shape: bf16[128,128], index: 4, kind: input, shape index: {}]   ;;  %s1753_s5 = inlined_call_operand.vmem [shape: f32[1,128], index: 5, kind: input, shape index: {}]   ;;  %s1754_s6 = inlined_call_operand.hbm [shape: f32[128,384], index: 6, kind: output, shape index: {0}]   ;;  %s1755_s7 = inlined_call_operand.hbm [shape: f32[128,128], index: 7, kind: output, shape index: {1}]   ;;  %s1756_s8 = inlined_call_operand.hbm [shape: f32[128,128], index: 8, kind: output, shape index: {2}]  }
   0x1   :  { %15 = vsyncpa [#allocation6], 0 }
   0x2   :  { %16 = vsyncpa [#allocation9], 0 }
   0x3   :  { %17 = vsyncpa [#allocation4], 0 }
   0x4   :  { %18 = vsyncpa [#allocation12], 0  ;;  %s1340_s27 = smov [#allocation5]  }
   0x5   :  { %s36_s28 = sshll.u32 %s1340_s27, 4  ;;  %s37_s28 = int_to_ptr.vmem [resolvable:$true] %s36_s28 }
   0x6   :  { %s1198_s29 = scalar_lea.vmem %s37_s28, 2048  ;;  %p1203_p1 = scmp.lt.s32.totalorder %s37_s28, %s37_s28 }
   0x7   :  { %p1199_p0 = scmp.ne.s32.totalorder %s37_s28, %s1198_s29  ;;  %p1204_p2 = scmp.lt.s32.totalorder %s1198_s29, %s1198_s29 }
   0x9   :  { %p1205_p3 = por %p1204_p2, %p1203_p1 }
   0xb   :  { %p1206_p4 = pnand %p1205_p3, %p1199_p0 }
   0xd   :  { %1209 = shalt.err (!%p1206_p4)
}
   0xe   :  { %s1341_s30 = smov 128   ;;  %s1342_s9 = smov 8  }
   0xf   :  { %42 = dma.hbm_to_vmem [thread:$0]  %s1749_s1, 2048, %s37_s28, [#allocation6], %s1341_s30, %s1341_s30, %s1342_s9  }
  0x10   :  { %s1343_s12 = smov [#allocation2]  }
  0x11   :  { %s24_s13 = sshll.u32 %s1343_s12, 4  ;;  %s25_s13 = int_to_ptr.vmem [resolvable:$true] %s24_s13 }
  0x12   :  { %s1218_s14 = scalar_lea.vmem %s25_s13, 1024  ;;  %p1223_p6 = scmp.lt.s32.totalorder %s25_s13, %s25_s13 }
  0x13   :  { %p1219_p5 = scmp.ne.s32.totalorder %s25_s13, %s1218_s14  ;;  %p1224_p7 = scmp.lt.s32.totalorder %s1218_s14, %s1218_s14 }
  0x15   :  { %p1225_p8 = por %p1224_p7, %p1223_p6 }
  0x17   :  { %p1226_p9 = pnand %p1225_p8, %p1219_p5 }
  0x19   :  { %1229 = shalt.err (!%p1226_p9)
}
  0x1a   :  { %s1344_s15 = smov 64   ;;  %s1345_s16 = smov 4  }
  0x1b   :  { %30 = dma.hbm_to_vmem [thread:$0]  %s1748_s0, 1024, %s25_s13, [#allocation3], %s1344_s15, %s1344_s15, %s1345_s16  }
  0x1c   :  { %s1346_s19 = smov [#allocation7]   ;;  %s1347_s21 = smov [#allocation8]  }
  0x1d   :  { %s48_s20 = sshll.u32 %s1346_s19, 4  ;;  %s62_s1 = sshll.u32 %s1347_s21, 4  ;;  %s49_s20 = int_to_ptr.vmem [resolvable:$true] %s48_s20  ;;  %s63_s1 = int_to_ptr.vmem [resolvable:$true] %s62_s1 }
  0x1e   :  { %s1238_s22 = scalar_lea.vmem %s49_s20, 2048  ;;  %p1243_p11 = scmp.lt.s32.totalorder %s49_s20, %s49_s20 }
  0x1f   :  { %p1239_p10 = scmp.ne.s32.totalorder %s49_s20, %s1238_s22  ;;  %p1244_p12 = scmp.lt.s32.totalorder %s1238_s22, %s1238_s22 }
  0x21   :  { %p1245_p13 = por %p1244_p12, %p1243_p11 }
  0x23   :  { %p1246_p0 = pnand %p1245_p13, %p1239_p10 }
  0x25   :  { %1249 = shalt.err (!%p1246_p0)
}
  0x26   :  { %54 = dma.hbm_to_vmem [thread:$0]  %s1750_s2, 2048, %s49_s20, [#allocation6], %s1341_s30, %s1341_s30, %s1342_s9  }
  0x27   :  { %s1258_s0 = scalar_lea.vmem %s63_s1, 1024  ;;  %p1263_p2 = scmp.lt.s32.totalorder %s63_s1, %s63_s1 }
  0x28   :  { %p1259_p1 = scmp.ne.s32.totalorder %s63_s1, %s1258_s0  ;;  %p1264_p3 = scmp.lt.s32.totalorder %s1258_s0, %s1258_s0 }
  0x2a   :  { %p1265_p4 = por %p1264_p3, %p1263_p2 }
  0x2c   :  { %p1266_p5 = pnand %p1265_p4, %p1259_p1 }
  0x2e   :  { %1269 = shalt.err (!%p1266_p5)
}
  0x2f   :  { %68 = dma.hbm_to_vmem [thread:$0]  %s1752_s4, 1024, %s63_s1, [#allocation9], %s1344_s15, %s1344_s15, %s1345_s16  }
  0x30   :  { %1330 = dma.done.wait [#allocation3], 1024  }
  0x31   :  { %1331 = vsyncadd [#allocation3], 4294966272 }
  0x32   :  { %1332 = dma.done.wait [#allocation6], 4096  }
  0x33   :  { %1333 = vsyncadd [#allocation6], 4294963200 }
  0x34   :  { %1334 = dma.done.wait [#allocation9], 1024  }
  0x35   :  { %1335 = vsyncadd [#allocation9], 4294966272  ;;  %v1348_v0 = vmov 0   ;;  %v1110_v1 = vld [vmem:[#allocation7 + $0x74] ss:$8 sps:$4 sm:$0xff]   ;;  %v1417_v17 = vld [vmem:[#allocation2] sm:$0xff]   ;;  %v118_v33 = vlaneseq }
  0x36   :  { %288 = vmatprep.mubr.bf16.mxu0 %v1348_v0  ;;  %v1112_v2 = vld [vmem:[#allocation7 + $0x70] ss:$8 sps:$4 sm:$0xff]   ;;  %256 = vmatprep.subr.bf16.mxu0 %v1110_v1  ;;  %v1113_v3 = vld [vmem:[#allocation7 + $0x64] ss:$8 sps:$4 sm:$0xff]   ;;  %v1115_v4 = vld [vmem:[#allocation7 + $0x60] ss:$8 sps:$4 sm:$0xff]  }
  0x37   :  { %257 = vmatpush1.bf16.msra.mxu0 %v1112_v2  ;;  %v1116_v5 = vld [vmem:[#allocation7 + $0x54] ss:$8 sps:$4 sm:$0xff]   ;;  %v1118_v6 = vld [vmem:[#allocation7 + $0x50] ss:$8 sps:$4 sm:$0xff]   ;;  %v1119_v7 = vld [vmem:[#allocation7 + $0x44] ss:$8 sps:$4 sm:$0xff]  }
  0x38   :  { %258 = vmatprep.subr.bf16.mxu0 %v1113_v3  ;;  %v1121_v8 = vld [vmem:[#allocation7 + $0x40] ss:$8 sps:$4 sm:$0xff]   ;;  %v1122_v9 = vld [vmem:[#allocation7 + $0x34] ss:$8 sps:$4 sm:$0xff]   ;;  %v1124_v10 = vld [vmem:[#allocation7 + $0x30] ss:$8 sps:$4 sm:$0xff]  }
  0x39   :  { %v1125_v11 = vld [vmem:[#allocation7 + $0x24] ss:$8 sps:$4 sm:$0xff]   ;;  %v1127_v12 = vld [vmem:[#allocation7 + $0x20] ss:$8 sps:$4 sm:$0xff]   ;;  %v1128_v13 = vld [vmem:[#allocation7 + $0x14] ss:$8 sps:$4 sm:$0xff]  }
  0x3a   :  { %v1130_v14 = vld [vmem:[#allocation7 + $0x10] ss:$8 sps:$4 sm:$0xff]   ;;  %v1131_v15 = vld [vmem:[#allocation7 + $0x4] ss:$8 sps:$4 sm:$0xff]   ;;  %v1133_v16 = vld [vmem:[#allocation7] ss:$8 sps:$4 sm:$0xff]  }
  0x3b   :  { %259 = vmatpush1.bf16.msra.mxu0 %v1115_v4  ;;  %v1420_v18 = vld [vmem:[#allocation2 + $0x8] sm:$0xff]   ;;  %v1423_v19 = vld [vmem:[#allocation2 + $0x10] sm:$0xff]   ;;  %v1426_v20 = vld [vmem:[#allocation2 + $0x18] sm:$0xff]   ;;  %v119_v34 = vshrl.u32 %v118_v33, 7  ;;  %s1350_s29 = smov [#allocation10]  }
  0x3c   :  { %260 = vmatprep.subr.bf16.mxu0 %v1116_v5  ;;  %v1429_v21 = vld [vmem:[#allocation2 + $0x20] sm:$0xff]   ;;  %v1432_v22 = vld [vmem:[#allocation2 + $0x28] sm:$0xff]   ;;  %v1435_v23 = vld [vmem:[#allocation2 + $0x30] sm:$0xff]   ;;  %s970_s10 = sshll.u32 %s1350_s29, 4  ;;  %s971_s10 = int_to_ptr.vmem [resolvable:$true] %s970_s10 }
  0x3d   :  { %v1438_v24 = vld [vmem:[#allocation2 + $0x38] sm:$0xff]   ;;  %v1143_v26 = vld [vmem:[#allocation8 + $0x30] sm:$0xff]   ;;  %v1144_v27 = vld [vmem:[#allocation8 + $0x28] sm:$0xff]   ;;  %v120_v35 = vsub.s32 0, %v119_v34  ;;  %v124_v37 = vsub.s32 1, %v119_v34 }
  0x3e   :  { %v1142_v25 = vld [vmem:[#allocation8 + $0x38] sm:$0xff]   ;;  %v1145_v28 = vld [vmem:[#allocation8 + $0x20] sm:$0xff]   ;;  %v1147_v30 = vld [vmem:[#allocation8 + $0x10] sm:$0xff]  }
  0x3f   :  { %261 = vmatpush1.bf16.msra.mxu0 %v1118_v6  ;;  %1064 = vmatprep.subr.bf16.mxu1 %v1142_v25  ;;  %v1146_v29 = vld [vmem:[#allocation8 + $0x18] sm:$0xff]   ;;  %v1148_v31 = vld [vmem:[#allocation8 + $0x8] sm:$0xff]   ;;  %v1149_v32 = vld [vmem:[#allocation8] sm:$0xff]  }
  0x40   :  { %262 = vmatprep.subr.bf16.mxu0 %v1119_v7  ;;  %1065 = vmatpush3.bf16.msra.mxu1 %v1142_v25  ;;  %v116_v36 = vld [vmem:[%s1751_s3] sm:$0x3] }
  0x41   :  { %1066 = vmatprep.subr.bf16.mxu1 %v1143_v26  ;;  %v1445_v38 = vrot.slane %v116_v36, %v120_v35  ;;  %v1447_v39 = vrot.slane %v116_v36, %v124_v37 }
  0x43   :  { %263 = vmatpush1.bf16.msra.mxu0 %v1121_v8  ;;  %v433_v8 = vld [vmem:[#allocation5] sm:$0xff] }
  0x44   :  { %264 = vmatprep.subr.bf16.mxu0 %v1122_v9  ;;  %1067 = vmatpush3.bf16.msra.mxu1 %v1143_v26 }
  0x45   :  { %1068 = vmatprep.subr.bf16.mxu1 %v1144_v27 }
  0x47   :  { %265 = vmatpush1.bf16.msra.mxu0 %v1124_v10 }
  0x48   :  { %266 = vmatprep.subr.bf16.mxu0 %v1125_v11  ;;  %1069 = vmatpush3.bf16.msra.mxu1 %v1144_v27 }
  0x49   :  { %1070 = vmatprep.subr.bf16.mxu1 %v1145_v28 }
  0x4b   :  { %267 = vmatpush1.bf16.msra.mxu0 %v1127_v12 }
  0x4c   :  { %268 = vmatprep.subr.bf16.mxu0 %v1128_v13  ;;  %1071 = vmatpush3.bf16.msra.mxu1 %v1145_v28 }
  0x4d   :  { %1072 = vmatprep.subr.bf16.mxu1 %v1146_v29 }
  0x4f   :  { %269 = vmatpush1.bf16.msra.mxu0 %v1130_v14 }
  0x50   :  { %270 = vmatprep.subr.bf16.mxu0 %v1131_v15  ;;  %1073 = vmatpush3.bf16.msra.mxu1 %v1146_v29  ;;  %v434_v29 = vld [vmem:[#allocation5 + $0x8] sm:$0xff] }
  0x51   :  { %1074 = vmatprep.subr.bf16.mxu1 %v1147_v30 }
  0x53   :  { %271 = vmatpush1.bf16.msra.mxu0 %v1133_v16 }
  0x54   :  { %1075 = vmatpush3.bf16.msra.mxu1 %v1147_v30 }
  0x55   :  { %1076 = vmatprep.subr.bf16.mxu1 %v1148_v31 }
  0x56   :  { %289 = vmatmul.mubr.bf16.vlgmr.msra.gmra.mxu0 %v1417_v17 }
  0x57   :  { %298 = vmatprep.mubr.bf16.mxu0 %v1348_v0 }
  0x58   :  { %1077 = vmatpush3.bf16.msra.mxu1 %v1148_v31 }
  0x59   :  { %1078 = vmatprep.subr.bf16.mxu1 %v1149_v32 }
  0x5c   :  { %1079 = vmatpush3.bf16.msra.mxu1 %v1149_v32 }
  0x5e   :  { %299 = vmatmul.mubr.bf16.gmra.mxu0 %v1420_v18 }
  0x5f   :  { %308 = vmatprep.mubr.bf16.mxu0 %v1348_v0 }
  0x66   :  { %309 = vmatmul.mubr.bf16.gmra.mxu0 %v1423_v19 }
  0x67   :  { %318 = vmatprep.mubr.bf16.mxu0 %v1348_v0 }
  0x6e   :  { %319 = vmatmul.mubr.bf16.gmra.mxu0 %v1426_v20 }
  0x6f   :  { %328 = vmatprep.mubr.bf16.mxu0 %v1348_v0 }
  0x76   :  { %329 = vmatmul.mubr.bf16.gmra.mxu0 %v1429_v21 }
  0x77   :  { %338 = vmatprep.mubr.bf16.mxu0 %v1348_v0 }
  0x7e   :  { %339 = vmatmul.mubr.bf16.gmra.mxu0 %v1432_v22 }
  0x7f   :  { %348 = vmatprep.mubr.bf16.mxu0 %v1348_v0 }
  0x86   :  { %349 = vmatmul.mubr.bf16.gmra.mxu0 %v1435_v23 }
  0x87   :  { %358 = vmatprep.mubr.bf16.mxu0 %v1348_v0 }
  0x8e   :  { %359 = vmatmul.mubr.bf16.gmra.mxu0 %v1438_v24 }
 0x116   :  { %v290_v40 = vpop.f32.mrf.mxu0 }
 0x117   :  { %v291_v41 = vadd.f32 %v290_v40, %v1445_v38 }
 0x118   :  { %v292_v42 = vpop.f32.mrf.mxu0 }
 0x119   :  { %657 = vst [vmem:[#allocation10] sm:$0xff] %v291_v41  ;;  %v293_v43 = vadd.f32 %v292_v42, %v1447_v39  ;;  %v817_v11 = vmul.f32 %v291_v41, %v291_v41 }
 0x11a   :  { %v294_v44 = vpop.f32.mrf.mxu0 }
 0x11b   :  { %v369_v45 = vmul.f32 0.5, %v293_v43  ;;  %v1452_v46 = vadd.f32 %v294_v44, %v1445_v38  ;;  %v801_v4 = vadd.f32 1.0, %v293_v43 }
 0x11c   :  { %v296_v47 = vpop.f32.mrf.mxu0 }
 0x11d   :  { %v385_v48 = vmul.f32 1.442695, %v369_v45  ;;  %658 = vst [vmem:[#allocation10 + $0x18] sm:$0xff] %v1452_v46  ;;  %v297_v49 = vadd.f32 %v296_v47, %v1447_v39  ;;  %v833_v25 = vsub.f32 %v801_v4, %v817_v11  ;;  %v818_v31 = vmul.f32 %v1452_v46, %v1452_v46  ;;  %v436_v4 = vld [vmem:[#allocation5 + $0x18] sm:$0xff] }
 0x11e   :  { %v300_v50 = vpop.f32.mrf.mxu0 }
 0x11f   :  { %1158 = vpow2.f32 %v385_v48  ;;  %v370_v51 = vmul.f32 0.5, %v297_v49  ;;  %v1457_v52 = vadd.f32 %v300_v50, %v1445_v38  ;;  %v802_v15 = vadd.f32 1.0, %v297_v49 }
 0x120   :  { %v302_v53 = vpop.f32.mrf.mxu0 }
 0x121   :  { %v387_v54 = vmul.f32 1.442695, %v370_v51  ;;  %659 = vst [vmem:[#allocation10 + $0x30] sm:$0xff] %v1457_v52  ;;  %v303_v55 = vadd.f32 %v302_v53, %v1447_v39  ;;  %v834_v44 = vsub.f32 %v802_v15, %v818_v31 }
 0x122   :  { %v304_v56 = vpop.f32.mrf.mxu0 }
 0x123   :  { %1160 = vpow2.f32 %v387_v54  ;;  %v371_v57 = vmul.f32 0.5, %v303_v55  ;;  %v1462_v58 = vadd.f32 %v304_v56, %v1445_v38  ;;  %v803_v42 = vadd.f32 1.0, %v303_v55 }
 0x124   :  { %v306_v59 = vpop.f32.mrf.mxu0  ;;  %v819_v54 = vmul.f32 %v1457_v52, %v1457_v52 }
 0x125   :  { %v389_v60 = vmul.f32 1.442695, %v371_v57  ;;  %660 = vst [vmem:[#allocation10 + $0x48] sm:$0xff] %v1462_v58  ;;  %v307_v61 = vadd.f32 %v306_v59, %v1447_v39 }
 0x126   :  { %v310_v62 = vpop.f32.mrf.mxu0 }
 0x127   :  { %1162 = vpow2.f32 %v389_v60  ;;  %v372_v63 = vmul.f32 0.5, %v307_v61  ;;  %v1467_v0 = vadd.f32 %v310_v62, %v1445_v38  ;;  %v804_v59 = vadd.f32 1.0, %v307_v61 }
 0x128   :  { %v312_v1 = vpop.f32.mrf.mxu0 }
 0x129   :  { %v391_v2 = vmul.f32 1.442695, %v372_v63  ;;  %661 = vst [vmem:[#allocation10 + $0x60] sm:$0xff] %v1467_v0  ;;  %v1471_v3 = vadd.f32 %v312_v1, %v1447_v39  ;;  %v835_v63 = vsub.f32 %v803_v42, %v819_v54 }
 0x12a   :  { %v314_v5 = vpop.f32.mrf.mxu0 }
 0x12b   :  { %1164 = vpow2.f32 %v391_v2  ;;  %v373_v6 = vmul.f32 0.5, %v1471_v3  ;;  %v1475_v7 = vadd.f32 %v314_v5, %v1445_v38 }
 0x12c   :  { %v1159_v9 = vpop.eup %1158  ;;  %v316_v10 = vpop.f32.mrf.mxu0 }
 0x12d   :  { %v393_v12 = vmul.f32 1.442695, %v373_v6  ;;  %662 = vst [vmem:[#allocation10 + $0x78] sm:$0xff] %v1475_v7  ;;  %v1479_v13 = vadd.f32 %v316_v10, %v1447_v39  ;;  %v417_v14 = vmul.f32 %v1159_v9, %v1159_v9  ;;  %v449_v26 = vmul.f32 %v1159_v9, %v433_v8 }
 0x12e   :  { %v320_v16 = vpop.f32.mrf.mxu0  ;;  %v820_v6 = vmul.f32 %v1462_v58, %v1462_v58 }
 0x12f   :  { %1166 = vpow2.f32 %v393_v12  ;;  %v374_v27 = vmul.f32 0.5, %v1479_v13  ;;  %v1483_v28 = vadd.f32 %v320_v16, %v1445_v38  ;;  %673 = vst [vmem:[#allocation10 + $0x8] sm:$0xff] %v417_v14  ;;  %v849_v34 = vsub.f32 %v833_v25, %v417_v14 }
 0x130   :  { %v1161_v30 = vpop.eup %1160  ;;  %v322_v32 = vpop.f32.mrf.mxu0  ;;  %v465_v35 = vadd.f32 %v449_v26, %v291_v41  ;;  %v435_v41 = vld [vmem:[#allocation5 + $0x10] sm:$0xff]  ;;  %v805_v14 = vadd.f32 1.0, %v1471_v3  ;;  %v836_v16 = vsub.f32 %v804_v59, %v820_v6 }
 0x131   :  { %v395_v36 = vmul.f32 1.442695, %v374_v27  ;;  %663 = vst [vmem:[#allocation10 + $0x90] sm:$0xff] %v1483_v28  ;;  %v1489_v37 = vadd.f32 %v322_v32, %v1447_v39  ;;  %v418_v40 = vmul.f32 %v1161_v30, %v1161_v30  ;;  %865 = vadd.xlane.f32.xlu0 %v849_v34  ;;  %v450_v45 = vmul.f32 %v1161_v30, %v434_v29 }
 0x132   :  { %v324_v43 = vpop.f32.mrf.mxu0  ;;  %689 = vst [vmem:[#allocation10 + $0x10] sm:$0xff] %v465_v35  ;;  %v821_v30 = vmul.f32 %v1467_v0, %v1467_v0 }
 0x133   :  { %1168 = vpow2.f32 %v395_v36  ;;  %v375_v47 = vmul.f32 0.5, %v1489_v37  ;;  %v1493_v48 = vadd.f32 %v324_v43, %v1445_v38  ;;  %674 = vst [vmem:[#allocation10 + $0x20] sm:$0xff] %v418_v40  ;;  %v850_v51 = vsub.f32 %v834_v44, %v418_v40 }
 0x134   :  { %v1163_v49 = vpop.eup %1162  ;;  %v326_v50 = vpop.f32.mrf.mxu0  ;;  %v466_v53 = vadd.f32 %v450_v45, %v1452_v46  ;;  %v806_v40 = vadd.f32 1.0, %v1479_v13  ;;  %v837_v44 = vsub.f32 %v805_v14, %v821_v30  ;;  %v807_v59 = vadd.f32 1.0, %v1489_v37 }
 0x135   :  { %v397_v55 = vmul.f32 1.442695, %v375_v47  ;;  %664 = vst [vmem:[#allocation10 + $0xa8] sm:$0xff] %v1493_v48  ;;  %v1500_v56 = vadd.f32 %v326_v50, %v1447_v39  ;;  %v419_v57 = vmul.f32 %v1163_v49, %v1163_v49  ;;  %867 = vadd.xlane.f32.xlu0 %v850_v51  ;;  %v451_v1 = vmul.f32 %v1163_v49, %v435_v41  ;;  %v438_v41 = vld [vmem:[#allocation5 + $0x28] sm:$0xff] }
 0x136   :  { %v330_v60 = vpop.f32.mrf.mxu0  ;;  %v481_v62 = vpack.c.bf16 %v466_v53, %v465_v35  ;;  %690 = vst [vmem:[#allocation10 + $0x28] sm:$0xff] %v466_v53  ;;  %v822_v50 = vmul.f32 %v1475_v7, %v1475_v7  ;;  %v824_v30 = vmul.f32 %v1493_v48, %v1493_v48 }
 0x137   :  { %1170 = vpow2.f32 %v397_v55  ;;  %v376_v46 = vmul.f32 0.5, %v1500_v56  ;;  %v1504_v2 = vadd.f32 %v330_v60, %v1445_v38  ;;  %675 = vst [vmem:[#allocation10 + $0x38] sm:$0xff] %v419_v57  ;;  %v851_v8 = vsub.f32 %v835_v63, %v419_v57 }
 0x138   :  { %v1165_v5 = vpop.eup %1164  ;;  %1080 = vmatprep.mubr.bf16.mxu1 %v481_v62  ;;  %v332_v61 = vpop.f32.mrf.mxu0  ;;  %v467_v9 = vadd.f32 %v451_v1, %v1457_v52  ;;  %v437_v52 = vld [vmem:[#allocation5 + $0x20] sm:$0xff]  ;;  %v838_v62 = vsub.f32 %v806_v40, %v822_v50 }
 0x139   :  { %v399_v10 = vmul.f32 1.442695, %v376_v46  ;;  %665 = vst [vmem:[#allocation10 + $0xc0] sm:$0xff] %v1504_v2  ;;  %v1511_v11 = vadd.f32 %v332_v61, %v1447_v39  ;;  %v420_v12 = vmul.f32 %v1165_v5, %v1165_v5  ;;  %869 = vadd.xlane.f32.xlu1 %v851_v8  ;;  %v452_v25 = vmul.f32 %v1165_v5, %v436_v4 }
 0x13a   :  { %v334_v15 = vpop.f32.mrf.mxu0  ;;  %691 = vst [vmem:[#allocation10 + $0x40] sm:$0xff] %v467_v9  ;;  %v823_v5 = vmul.f32 %v1483_v28, %v1483_v28 }
 0x13b   :  { %1172 = vpow2.f32 %v399_v10  ;;  %v377_v26 = vmul.f32 0.5, %v1511_v11  ;;  %v1516_v27 = vadd.f32 %v334_v15, %v1445_v38  ;;  %676 = vst [vmem:[#allocation10 + $0x50] sm:$0xff] %v420_v12  ;;  %v852_v32 = vsub.f32 %v836_v16, %v420_v12 }
 0x13c   :  { %v1167_v29 = vpop.eup %1166  ;;  %v336_v31 = vpop.f32.mrf.mxu0  ;;  %v468_v3 = vadd.f32 %v452_v25, %v1462_v58  ;;  %v808_v12 = vadd.f32 1.0, %v1500_v56  ;;  %v839_v16 = vsub.f32 %v807_v59, %v823_v5  ;;  %v809_v40 = vadd.f32 1.0, %v1511_v11 }
 0x13d   :  { %v401_v34 = vmul.f32 1.442695, %v377_v26  ;;  %666 = vst [vmem:[#allocation10 + $0xd8] sm:$0xff] %v1516_v27  ;;  %v1523_v35 = vadd.f32 %v336_v31, %v1447_v39  ;;  %v421_v36 = vmul.f32 %v1167_v29, %v1167_v29  ;;  %871 = vadd.xlane.f32.xlu1 %v852_v32  ;;  %v453_v45 = vmul.f32 %v1167_v29, %v437_v52  ;;  %v440_v52 = vld [vmem:[#allocation5 + $0x38] sm:$0xff] }
 0x13e   :  { %v340_v42 = vpop.f32.mrf.mxu0  ;;  %v482_v43 = vpack.c.bf16 %v468_v3, %v467_v9  ;;  %692 = vst [vmem:[#allocation10 + $0x58] sm:$0xff] %v468_v3  ;;  %v826_v5 = vmul.f32 %v1516_v27, %v1516_v27 }
 0x13f   :  { %1174 = vpow2.f32 %v401_v34  ;;  %v378_v47 = vmul.f32 0.5, %v1523_v35  ;;  %v1528_v58 = vadd.f32 %v340_v42, %v1445_v38  ;;  %677 = vst [vmem:[#allocation10 + $0x68] sm:$0xff] %v421_v36  ;;  %v853_v51 = vsub.f32 %v837_v44, %v421_v36 }
 0x140   :  { %v1169_v49 = vpop.eup %1168  ;;  %1081 = vmatmul.mubr.bf16.vlgmr.msra.gmra.mxu1 %v482_v43  ;;  %v342_v13 = vpop.f32.mrf.mxu0  ;;  %v469_v53 = vadd.f32 %v453_v45, %v1467_v0  ;;  %v439_v0 = vld [vmem:[#allocation5 + $0x30] sm:$0xff]  ;;  %v840_v43 = vsub.f32 %v808_v12, %v824_v30 }
 0x141   :  { %v403_v54 = vmul.f32 1.442695, %v378_v47  ;;  %667 = vst [vmem:[#allocation10 + $0xf0] sm:$0xff] %v1528_v58  ;;  %v1535_v55 = vadd.f32 %v342_v13, %v1447_v39  ;;  %v422_v57 = vmul.f32 %v1169_v49, %v1169_v49  ;;  %873 = vadd.xlane.f32.xlu0 %v853_v51  ;;  %v454_v63 = vmul.f32 %v1169_v49, %v438_v41 }
 0x142   :  { %v344_v60 = vpop.f32.mrf.mxu0  ;;  %693 = vst [vmem:[#allocation10 + $0x70] sm:$0xff] %v469_v53  ;;  %v825_v49 = vmul.f32 %v1504_v2, %v1504_v2 }
 0x143   :  { %1176 = vpow2.f32 %v403_v54  ;;  %v379_v1 = vmul.f32 0.5, %v1535_v55  ;;  %v1540_v46 = vadd.f32 %v344_v60, %v1445_v38  ;;  %678 = vst [vmem:[#allocation10 + $0x80] sm:$0xff] %v422_v57  ;;  %v854_v61 = vsub.f32 %v838_v62, %v422_v57 }
 0x144   :  { %v1171_v4 = vpop.eup %1170  ;;  %v346_v6 = vpop.f32.mrf.mxu0  ;;  %v470_v37 = vadd.f32 %v454_v63, %v1475_v7  ;;  %v810_v57 = vadd.f32 1.0, %v1523_v35  ;;  %v841_v62 = vsub.f32 %v809_v40, %v825_v49  ;;  %v811_v35 = vadd.f32 1.0, %v1535_v55 }
 0x145   :  { %v405_v8 = vmul.f32 1.442695, %v379_v1  ;;  %668 = vst [vmem:[#allocation10 + $0x108] sm:$0xff] %v1540_v46  ;;  %v1547_v9 = vadd.f32 %v346_v6, %v1447_v39  ;;  %v423_v10 = vmul.f32 %v1171_v4, %v1171_v4  ;;  %875 = vadd.xlane.f32.xlu1 %v854_v61  ;;  %v455_v25 = vmul.f32 %v1171_v4, %v439_v0  ;;  %v442_v0 = vld [vmem:[#allocation5 + $0x48] sm:$0xff] }
 0x146   :  { %v350_v14 = vpop.f32.mrf.mxu0  ;;  %v483_v15 = vpack.c.bf16 %v470_v37, %v469_v53  ;;  %694 = vst [vmem:[#allocation10 + $0x88] sm:$0xff] %v470_v37 }
 0x147   :  { %1178 = vpow2.f32 %v405_v8  ;;  %v380_v26 = vmul.f32 0.5, %v1547_v9  ;;  %v1552_v7 = vadd.f32 %v350_v14, %v1445_v38  ;;  %679 = vst [vmem:[#allocation10 + $0x98] sm:$0xff] %v423_v10  ;;  %v855_v31 = vsub.f32 %v839_v16, %v423_v10 }
 0x148   :  { %v1173_v29 = vpop.eup %1172  ;;  %1084 = vmatprep.mubr.bf16.mxu1 %v483_v15  ;;  %v352_v56 = vpop.f32.mrf.mxu0  ;;  %v471_v32 = vadd.f32 %v455_v25, %v1483_v28  ;;  %v441_v28 = vld [vmem:[#allocation5 + $0x40] sm:$0xff]  ;;  %v827_v14 = vmul.f32 %v1528_v58, %v1528_v58  ;;  %v842_v16 = vsub.f32 %v810_v57, %v826_v5 }
 0x149   :  { %v407_v3 = vmul.f32 1.442695, %v380_v26  ;;  %669 = vst [vmem:[#allocation10 + $0x120] sm:$0xff] %v1552_v7  ;;  %v1559_v34 = vadd.f32 %v352_v56, %v1447_v39  ;;  %v424_v36 = vmul.f32 %v1173_v29, %v1173_v29  ;;  %877 = vadd.xlane.f32.xlu0 %v855_v31  ;;  %v456_v44 = vmul.f32 %v1173_v29, %v440_v52  ;;  %v443_v26 = vld [vmem:[#allocation5 + $0x50] sm:$0xff] }
 0x14a   :  { %v354_v42 = vpop.f32.mrf.mxu0  ;;  %695 = vst [vmem:[#allocation10 + $0xa0] sm:$0xff] %v471_v32  ;;  %v843_v31 = vsub.f32 %v811_v35, %v827_v14 }
 0x14b   :  { %1180 = vpow2.f32 %v407_v3  ;;  %v381_v45 = vmul.f32 0.5, %v1559_v34  ;;  %v1564_v47 = vadd.f32 %v354_v42, %v1445_v38  ;;  %680 = vst [vmem:[#allocation10 + $0xb0] sm:$0xff] %v424_v36  ;;  %v856_v13 = vsub.f32 %v840_v43, %v424_v36 }
 0x14c   :  { %v1175_v41 = vpop.eup %1174  ;;  %v356_v50 = vpop.f32.mrf.mxu0  ;;  %v472_v11 = vadd.f32 %v456_v44, %v1493_v48  ;;  %v828_v44 = vmul.f32 %v1540_v46, %v1540_v46 }
 0x14d   :  { %v409_v51 = vmul.f32 1.442695, %v381_v45  ;;  %670 = vst [vmem:[#allocation10 + $0x138] sm:$0xff] %v1564_v47  ;;  %v1571_v53 = vadd.f32 %v356_v50, %v1447_v39  ;;  %v425_v54 = vmul.f32 %v1175_v41, %v1175_v41  ;;  %879 = vadd.xlane.f32.xlu1 %v856_v13  ;;  %v457_v63 = vmul.f32 %v1175_v41, %v441_v28 }
 0x14e   :  { %v360_v59 = vpop.f32.mrf.mxu0  ;;  %v484_v60 = vpack.c.bf16 %v472_v11, %v471_v32  ;;  %696 = vst [vmem:[#allocation10 + $0xb8] sm:$0xff] %v472_v11  ;;  %v812_v32 = vadd.f32 1.0, %v1547_v9  ;;  %v813_v9 = vadd.f32 1.0, %v1559_v34  ;;  %v829_v11 = vmul.f32 %v1552_v7, %v1552_v7 }
 0x14f   :  { %1182 = vpow2.f32 %v409_v51  ;;  %v382_v1 = vmul.f32 0.5, %v1571_v53  ;;  %v1576_v48 = vadd.f32 %v360_v59, %v1445_v38  ;;  %681 = vst [vmem:[#allocation10 + $0xc8] sm:$0xff] %v425_v54  ;;  %v857_v61 = vsub.f32 %v841_v62, %v425_v54  ;;  %v445_v51 = vld [vmem:[#allocation5 + $0x60] sm:$0xff] }
 0x150   :  { %v1177_v4 = vpop.eup %1176  ;;  %1085 = vmatmul.mubr.bf16.gmra.mxu1 %v484_v60  ;;  %v362_v6 = vpop.f32.mrf.mxu0  ;;  %v473_v37 = vadd.f32 %v457_v63, %v1504_v2  ;;  %v844_v50 = vsub.f32 %v812_v32, %v828_v44  ;;  %v845_v34 = vsub.f32 %v813_v9, %v829_v11  ;;  %v814_v60 = vadd.f32 1.0, %v1571_v53 }
 0x151   :  { %v411_v8 = vmul.f32 1.442695, %v382_v1  ;;  %671 = vst [vmem:[#allocation10 + $0x150] sm:$0xff] %v1576_v48  ;;  %v1584_v10 = vadd.f32 %v362_v6, %v1447_v39  ;;  %v426_v12 = vmul.f32 %v1177_v4, %v1177_v4  ;;  %881 = vadd.xlane.f32.xlu0 %v857_v61  ;;  %v458_v25 = vmul.f32 %v1177_v4, %v442_v0  ;;  %v446_v1 = vld [vmem:[#allocation5 + $0x68] sm:$0xff] }
 0x152   :  { %v364_v15 = vpop.f32.mrf.mxu0  ;;  %697 = vst [vmem:[#allocation10 + $0xd0] sm:$0xff] %v473_v37  ;;  %v830_v0 = vmul.f32 %v1564_v47, %v1564_v47  ;;  %v721_v44 = vunpack.c.l.bf16 %v1417_v17 }
 0x153   :  { %1184 = vpow2.f32 %v411_v8  ;;  %v383_v55 = vmul.f32 0.5, %v1584_v10  ;;  %v1590_v2 = vadd.f32 %v364_v15, %v1445_v38  ;;  %682 = vst [vmem:[#allocation10 + $0xe0] sm:$0xff] %v426_v12  ;;  %v858_v30 = vsub.f32 %v842_v16, %v426_v12  ;;  %v444_v38 = vld [vmem:[#allocation5 + $0x58] sm:$0xff]  ;;  %v447_v8 = vld [vmem:[#allocation5 + $0x70] sm:$0xff] }
 0x154   :  { %v1179_v52 = vpop.eup %1178  ;;  %v366_v29 = vpop.f32.mrf.mxu0  ;;  %v474_v56 = vadd.f32 %v458_v25, %v1516_v27  ;;  %v846_v53 = vsub.f32 %v814_v60, %v830_v0  ;;  %v728_v0 = vunpack.c.h.bf16 %v1426_v20 }
 0x155   :  { %v413_v3 = vmul.f32 1.442695, %v383_v55  ;;  %672 = vst [vmem:[#allocation10 + $0x168] sm:$0xff] %v1590_v2  ;;  %v367_v36 = vadd.f32 %v366_v29, %v1447_v39  ;;  %v427_v40 = vmul.f32 %v1179_v52, %v1179_v52  ;;  %883 = vadd.xlane.f32.xlu1 %v858_v30  ;;  %v459_v43 = vmul.f32 %v1179_v52, %v443_v26  ;;  %v448_v26 = vld [vmem:[#allocation5 + $0x78] sm:$0xff] }
 0x156   :  { %v485_v42 = vpack.c.bf16 %v474_v56, %v473_v37  ;;  %698 = vst [vmem:[#allocation10 + $0xe8] sm:$0xff] %v474_v56  ;;  %v831_v37 = vmul.f32 %v1576_v48, %v1576_v48  ;;  %v832_v52 = vmul.f32 %v1590_v2, %v1590_v2 }
 0x157   :  { %1186 = vpow2.f32 %v413_v3  ;;  %v384_v45 = vmul.f32 0.5, %v367_v36  ;;  %683 = vst [vmem:[#allocation10 + $0xf8] sm:$0xff] %v427_v40  ;;  %v859_v27 = vsub.f32 %v843_v31, %v427_v40  ;;  %v475_v41 = vadd.f32 %v459_v43, %v1528_v58 }
 0x158   :  { %v1181_v28 = vpop.eup %1180  ;;  %1088 = vmatprep.mubr.bf16.mxu1 %v485_v42  ;;  %v816_v25 = vadd.f32 1.0, %v367_v36  ;;  %v1618_v42 = vld [vmem:[%s1753_s5] ss:$0 sm:$0xff]  ;;  %s1349_s5 = smov [#allocation11]  }
 0x159   :  { %v415_v39 = vmul.f32 1.442695, %v384_v45  ;;  %885 = vadd.xlane.f32.xlu0 %v859_v27  ;;  %v428_v49 = vmul.f32 %v1181_v28, %v1181_v28  ;;  %v460_v13 = vmul.f32 %v1181_v28, %v444_v38  ;;  %699 = vst [vmem:[#allocation10 + $0x100] sm:$0xff] %v475_v41  ;;  %v724_v28 = vunpack.c.h.bf16 %v1420_v18  ;;  %s982_s28 = sshll.u32 %s1349_s5, 4  ;;  %s983_s28 = int_to_ptr.vmem [resolvable:$true] %s982_s28 }
 0x15a   :  { %v848_v31 = vsub.f32 %v816_v25, %v832_v52  ;;  %s1270_s11 = scalar_lea.vmem %s983_s28, 2048  ;;  %p1275_p7 = scmp.lt.s32.totalorder %s983_s28, %s983_s28 }
 0x15b   :  { %1188 = vpow2.f32 %v415_v39  ;;  %684 = vst [vmem:[#allocation10 + $0x110] sm:$0xff] %v428_v49  ;;  %v860_v54 = vsub.f32 %v844_v50, %v428_v49  ;;  %v476_v57 = vadd.f32 %v460_v13, %v1540_v46  ;;  %v815_v46 = vadd.f32 1.0, %v1584_v10  ;;  %p1271_p6 = scmp.ne.s32.totalorder %s983_s28, %s1270_s11  ;;  %p1276_p8 = scmp.lt.s32.totalorder %s1270_s11, %s1270_s11 }
 0x15c   :  { %v1183_v59 = vpop.eup %1182  ;;  %v722_v50 = vunpack.c.h.bf16 %v1417_v17  ;;  %v725_v17 = vunpack.c.l.bf16 %v1423_v19 }
 0x15d   :  { %887 = vadd.xlane.f32.xlu1 %v860_v54  ;;  %v486_v58 = vpack.c.bf16 %v476_v57, %v475_v41  ;;  %700 = vst [vmem:[#allocation10 + $0x118] sm:$0xff] %v476_v57  ;;  %v429_v62 = vmul.f32 %v1183_v59, %v1183_v59  ;;  %v461_v63 = vmul.f32 %v1183_v59, %v445_v51  ;;  %p1277_p9 = por %p1276_p8, %p1275_p7 }
 0x15e   :  { %v847_v16 = vsub.f32 %v815_v46, %v831_v37 }
 0x15f   :  { %1089 = vmatmul.mubr.bf16.gmra.mxu1 %v486_v58  ;;  %685 = vst [vmem:[#allocation10 + $0x128] sm:$0xff] %v429_v62  ;;  %v861_v4 = vsub.f32 %v845_v34, %v429_v62  ;;  %v477_v5 = vadd.f32 %v461_v63, %v1552_v7  ;;  %v727_v34 = vunpack.c.l.bf16 %v1426_v20  ;;  %p1278_p10 = pnand %p1277_p9, %p1271_p6 }
 0x160   :  { %v1185_v35 = vpop.eup %1184 }
 0x161   :  { %889 = vadd.xlane.f32.xlu0 %v861_v4  ;;  %v430_v6 = vmul.f32 %v1185_v35, %v1185_v35  ;;  %v462_v61 = vmul.f32 %v1185_v35, %v446_v1  ;;  %701 = vst [vmem:[#allocation10 + $0x130] sm:$0xff] %v477_v5 }
 0x163   :  { %686 = vst [vmem:[#allocation10 + $0x140] sm:$0xff] %v430_v6  ;;  %v862_v12 = vsub.f32 %v846_v53, %v430_v6  ;;  %v478_v14 = vadd.f32 %v462_v61, %v1564_v47  ;;  %v726_v6 = vunpack.c.h.bf16 %v1423_v19  ;;  %v729_v19 = vunpack.c.l.bf16 %v1429_v21 }
 0x164   :  { %v1187_v15 = vpop.eup %1186 }
 0x165   :  { %891 = vadd.xlane.f32.xlu1 %v862_v12  ;;  %v487_v7 = vpack.c.bf16 %v478_v14, %v477_v5  ;;  %702 = vst [vmem:[#allocation10 + $0x148] sm:$0xff] %v478_v14  ;;  %v431_v10 = vmul.f32 %v1187_v15, %v1187_v15  ;;  %v463_v55 = vmul.f32 %v1187_v15, %v447_v8  ;;  %v731_v15 = vunpack.c.l.bf16 %v1432_v22 }
 0x167   :  { %1092 = vmatprep.mubr.bf16.mxu1 %v487_v7  ;;  %687 = vst [vmem:[#allocation10 + $0x158] sm:$0xff] %v431_v10  ;;  %v863_v29 = vsub.f32 %v847_v16, %v431_v10  ;;  %v479_v30 = vadd.f32 %v463_v55, %v1576_v48  ;;  %v723_v48 = vunpack.c.l.bf16 %v1420_v18 }
 0x168   :  { %v1189_v56 = vpop.eup %1188 }
 0x169   :  { %893 = vadd.xlane.f32.xlu0 %v863_v29  ;;  %v432_v47 = vmul.f32 %v1189_v56, %v1189_v56  ;;  %v464_v32 = vmul.f32 %v1189_v56, %v448_v26  ;;  %703 = vst [vmem:[#allocation10 + $0x160] sm:$0xff] %v479_v30  ;;  %v732_v26 = vunpack.c.h.bf16 %v1432_v22 }
 0x16b   :  { %688 = vst [vmem:[#allocation10 + $0x170] sm:$0xff] %v432_v47  ;;  %v864_v3 = vsub.f32 %v848_v31, %v432_v47  ;;  %v480_v36 = vadd.f32 %v464_v32, %v1590_v2  ;;  %v730_v47 = vunpack.c.h.bf16 %v1429_v21 }
 0x16d   :  { %895 = vadd.xlane.f32.xlu1 %v864_v3  ;;  %v488_v40 = vpack.c.bf16 %v480_v36, %v479_v30  ;;  %704 = vst [vmem:[#allocation10 + $0x178] sm:$0xff] %v480_v36 }
 0x16f   :  { %1093 = vmatmul.mubr.bf16.gmra.mxu1 %v488_v40 }
 0x200   :  { %v1082_v38 = vpop.f32.mrf.mxu1 }
 0x201   :  { %v603_v43 = vadd.f32 %v1082_v38, %v1618_v42 }
 0x202   :  { %v594_v45 = vpop.f32.mrf.mxu1 }
 0x203   :  { %707 = vst [vmem:[#allocation11 + $0x10] sm:$0xff] %v603_v43  ;;  %v595_v2 = vadd.f32 %v1618_v42, %v594_v45  ;;  %v739_v27 = vsub.f32 %v723_v48, %v603_v43 }
 0x204   :  { %v1083_v9 = vpop.f32.mrf.mxu1 }
 0x205   :  { %705 = vst [vmem:[#allocation11] sm:$0xff] %v595_v2  ;;  %v606_v41 = vadd.f32 %v1083_v9, %v1618_v42  ;;  %v755_v39 = vmul.f32 %v739_v27, %v739_v27  ;;  %v737_v49 = vsub.f32 %v721_v44, %v595_v2  ;;  %v733_v44 = vunpack.c.l.bf16 %v1435_v23 }
 0x206   :  { %v597_v13 = vpop.f32.mrf.mxu1  ;;  %v735_v2 = vunpack.c.l.bf16 %v1438_v24 }
 0x207   :  { %708 = vst [vmem:[#allocation11 + $0x18] sm:$0xff] %v606_v41  ;;  %v598_v11 = vadd.f32 %v1618_v42, %v597_v13  ;;  %773 = vadd.xlane.f32.xlu0 %v755_v39  ;;  %v740_v51 = vsub.f32 %v724_v28, %v606_v41  ;;  %v753_v57 = vmul.f32 %v737_v49, %v737_v49  ;;  %v734_v41 = vunpack.c.h.bf16 %v1435_v23 }
 0x209   :  { %706 = vst [vmem:[#allocation11 + $0x8] sm:$0xff] %v598_v11  ;;  %v756_v54 = vmul.f32 %v740_v51, %v740_v51  ;;  %v738_v59 = vsub.f32 %v722_v50, %v598_v11  ;;  %v736_v11 = vunpack.c.h.bf16 %v1438_v24 }
 0x20b   :  { %775 = vadd.xlane.f32.xlu1 %v756_v54  ;;  %769 = vadd.xlane.f32.xlu0 %v753_v57  ;;  %v754_v18 = vmul.f32 %v738_v59, %v738_v59 }
 0x20f   :  { %771 = vadd.xlane.f32.xlu1 %v754_v18 }
 0x210   :  { %v1086_v60 = vpop.f32.mrf.mxu1 }
 0x211   :  { %v619_v58 = vadd.f32 %v1086_v60, %v1618_v42 }
 0x212   :  { %v610_v62 = vpop.f32.mrf.mxu1 }
 0x213   :  { %711 = vst [vmem:[#allocation11 + $0x30] sm:$0xff] %v619_v58  ;;  %v611_v63 = vadd.f32 %v1618_v42, %v610_v62  ;;  %v743_v1 = vsub.f32 %v727_v34, %v619_v58 }
 0x214   :  { %v1087_v4 = vpop.f32.mrf.mxu1 }
 0x215   :  { %709 = vst [vmem:[#allocation11 + $0x20] sm:$0xff] %v611_v63  ;;  %v622_v5 = vadd.f32 %v1087_v4, %v1618_v42  ;;  %v759_v35 = vmul.f32 %v743_v1, %v743_v1  ;;  %v741_v46 = vsub.f32 %v725_v17, %v611_v63 }
 0x216   :  { %v613_v53 = vpop.f32.mrf.mxu1 }
 0x217   :  { %712 = vst [vmem:[#allocation11 + $0x38] sm:$0xff] %v622_v5  ;;  %v614_v61 = vadd.f32 %v1618_v42, %v613_v53  ;;  %781 = vadd.xlane.f32.xlu0 %v759_v35  ;;  %v744_v37 = vsub.f32 %v728_v0, %v622_v5  ;;  %v757_v12 = vmul.f32 %v741_v46, %v741_v46 }
 0x219   :  { %710 = vst [vmem:[#allocation11 + $0x28] sm:$0xff] %v614_v61  ;;  %v760_v8 = vmul.f32 %v744_v37, %v744_v37  ;;  %v742_v14 = vsub.f32 %v726_v6, %v614_v61 }
 0x21b   :  { %783 = vadd.xlane.f32.xlu1 %v760_v8  ;;  %777 = vadd.xlane.f32.xlu0 %v757_v12  ;;  %v758_v20 = vmul.f32 %v742_v14, %v742_v14 }
 0x21f   :  { %779 = vadd.xlane.f32.xlu1 %v758_v20  ;;  %v1090_v16 = vpop.f32.mrf.mxu1 }
 0x220   :  { %v635_v25 = vadd.f32 %v1090_v16, %v1618_v42 }
 0x221   :  { %v626_v7 = vpop.f32.mrf.mxu1 }
 0x222   :  { %715 = vst [vmem:[#allocation11 + $0x50] sm:$0xff] %v635_v25  ;;  %v627_v10 = vadd.f32 %v1618_v42, %v626_v7  ;;  %v747_v55 = vsub.f32 %v731_v15, %v635_v25 }
 0x223   :  { %v1091_v52 = vpop.f32.mrf.mxu1 }
 0x224   :  { %713 = vst [vmem:[#allocation11 + $0x40] sm:$0xff] %v627_v10  ;;  %v638_v29 = vadd.f32 %v1091_v52, %v1618_v42  ;;  %v763_v30 = vmul.f32 %v747_v55, %v747_v55  ;;  %v745_v56 = vsub.f32 %v729_v19, %v627_v10 }
 0x225   :  { %v629_v31 = vpop.f32.mrf.mxu1 }
 0x226   :  { %716 = vst [vmem:[#allocation11 + $0x58] sm:$0xff] %v638_v29  ;;  %v630_v32 = vadd.f32 %v1618_v42, %v629_v31  ;;  %789 = vadd.xlane.f32.xlu0 %v763_v30  ;;  %v748_v3 = vsub.f32 %v732_v26, %v638_v29  ;;  %v761_v40 = vmul.f32 %v745_v56, %v745_v56 }
 0x228   :  { %714 = vst [vmem:[#allocation11 + $0x48] sm:$0xff] %v630_v32  ;;  %v764_v36 = vmul.f32 %v748_v3, %v748_v3  ;;  %v746_v48 = vsub.f32 %v730_v47, %v630_v32 }
 0x22a   :  { %791 = vadd.xlane.f32.xlu1 %v764_v36  ;;  %785 = vadd.xlane.f32.xlu0 %v761_v40  ;;  %v762_v22 = vmul.f32 %v746_v48, %v746_v48 }
 0x22e   :  { %787 = vadd.xlane.f32.xlu1 %v762_v22 }
 0x22f   :  { %v1094_v38 = vpop.f32.mrf.mxu1 }
 0x230   :  { %v651_v43 = vadd.f32 %v1094_v38, %v1618_v42 }
 0x231   :  { %v642_v21 = vpop.f32.mrf.mxu1 }
 0x232   :  { %719 = vst [vmem:[#allocation11 + $0x70] sm:$0xff] %v651_v43  ;;  %v643_v45 = vadd.f32 %v1618_v42, %v642_v21  ;;  %v751_v13 = vsub.f32 %v735_v2, %v651_v43 }
 0x233   :  { %v1095_v27 = vpop.f32.mrf.mxu1 }
 0x234   :  { %717 = vst [vmem:[#allocation11 + $0x60] sm:$0xff] %v643_v45  ;;  %v654_v28 = vadd.f32 %v1095_v27, %v1618_v42  ;;  %v749_v9 = vsub.f32 %v733_v44, %v643_v45  ;;  %v767_v57 = vmul.f32 %v751_v13, %v751_v13 }
 0x235   :  { %v645_v39 = vpop.f32.mrf.mxu1 }
 0x236   :  { %720 = vst [vmem:[#allocation11 + $0x78] sm:$0xff] %v654_v28  ;;  %v646_v49 = vadd.f32 %v1618_v42, %v645_v39  ;;  %v765_v50 = vmul.f32 %v749_v9, %v749_v9  ;;  %v752_v59 = vsub.f32 %v736_v11, %v654_v28 }
 0x238   :  { %718 = vst [vmem:[#allocation11 + $0x68] sm:$0xff] %v646_v49  ;;  %793 = vadd.xlane.f32.xlu0 %v765_v50  ;;  %v750_v51 = vsub.f32 %v734_v41, %v646_v49  ;;  %v768_v18 = vmul.f32 %v752_v59, %v752_v59 }
 0x23a   :  { %v766_v54 = vmul.f32 %v750_v51, %v750_v51 }
 0x23c   :  { %795 = vadd.xlane.f32.xlu1 %v766_v54  ;;  %797 = vadd.xlane.f32.xlu0 %v767_v57 }
 0x240   :  { %799 = vadd.xlane.f32.xlu1 %v768_v18 }
 0x241   :  { %1281 = shalt.err (!%p1278_p10)
}
 0x242   :  { %988 = dma.vmem_to_hbm [thread:$0]  %s983_s28, 2048, %s1755_s7, [#allocation12], %s1341_s30, %s1341_s30, %s1342_s9  }
 0x243   :  { %s1290_s14 = scalar_lea.vmem %s971_s10, 6144  ;;  %p1295_p12 = scmp.lt.s32.totalorder %s971_s10, %s971_s10 }
 0x244   :  { %p1291_p11 = scmp.ne.s32.totalorder %s971_s10, %s1290_s14  ;;  %p1296_p13 = scmp.lt.s32.totalorder %s1290_s14, %s1290_s14 }
 0x246   :  { %p1297_p0 = por %p1296_p13, %p1295_p12 }
 0x248   :  { %p1298_p1 = pnand %p1297_p0, %p1291_p11 }
 0x24a   :  { %1301 = shalt.err (!%p1298_p1)
}
 0x24b   :  { %s1351_s15 = smov 384   ;;  %s1352_s16 = smov 24   ;;  %v866_v23 = vpop.xlane.xlu0 %865  ;;  %v870_v24 = vpop.xlane.xlu1 %869  ;;  %v1664_v35 = vand.u32 127, %v118_v33 }
 0x24c   :  { %976 = dma.vmem_to_hbm [thread:$0]  %s971_s10, 6144, %s1754_s6, [#allocation4], %s1351_s15, %s1351_s15, %s1352_s16   ;;  %v899_v46 = vmul.f32 -0.5, %v870_v24  ;;  %v897_v61 = vmul.f32 -0.5, %v866_v23 }
 0x24d   :  { %vm915_vm0 = vcmp.eq.s32.totalorder %v1664_v35, 0  ;;  %vm916_vm1 = vcmp.eq.s32.totalorder %v1664_v35, 1  ;;  %s1353_s6 = smov [#allocation13]  }
 0x24e   :  { %v919_v37 = vsel %vm916_vm1, %v899_v46, 0.0  ;;  %v917_v20 = vsel %vm916_vm1, %v897_v61, 0.0  ;;  %s994_s7 = sshll.u32 %s1353_s6, 4  ;;  %s995_s7 = int_to_ptr.vmem [resolvable:$true] %s994_s7 }
 0x24f   :  { %v868_v42 = vpop.xlane.xlu0 %867  ;;  %v872_v34 = vpop.xlane.xlu1 %871  ;;  %s1310_s19 = scalar_lea.vmem %s995_s7, 2048  ;;  %p1315_p3 = scmp.lt.s32.totalorder %s995_s7, %s995_s7 }
 0x250   :  { %v900_v8 = vmul.f32 -0.5, %v872_v34  ;;  %v898_v15 = vmul.f32 -0.5, %v868_v42  ;;  %p1311_p2 = scmp.ne.s32.totalorder %s995_s7, %s1310_s19  ;;  %p1316_p4 = scmp.lt.s32.totalorder %s1310_s19, %s1310_s19 }
 0x252   :  { %v920_v16 = vsel %vm916_vm1, %v900_v8, 0.0  ;;  %v918_v55 = vsel %vm916_vm1, %v898_v15, 0.0  ;;  %p1317_p5 = por %p1316_p4, %p1315_p3 }
 0x253   :  { %v874_v60 = vpop.xlane.xlu0 %873  ;;  %v876_v58 = vpop.xlane.xlu1 %875 }
 0x254   :  { %v901_v30 = vmul.f32 -0.5, %v874_v60  ;;  %v902_v36 = vmul.f32 -0.5, %v876_v58  ;;  %p1318_p6 = pnand %p1317_p5, %p1311_p2 }
 0x256   :  { %v921_v3 = vsel %vm916_vm1, %v901_v30, 0.0  ;;  %v922_v44 = vsel %vm916_vm1, %v902_v36, 0.0 }
 0x257   :  { %v878_v17 = vpop.xlane.xlu0 %877  ;;  %v880_v62 = vpop.xlane.xlu1 %879 }
 0x258   :  { %v903_v29 = vmul.f32 -0.5, %v878_v17  ;;  %v904_v47 = vmul.f32 -0.5, %v880_v62 }
 0x25a   :  { %v923_v56 = vsel %vm916_vm1, %v903_v29, 0.0  ;;  %v924_v40 = vsel %vm916_vm1, %v904_v47, 0.0 }
 0x25b   :  { %v882_v63 = vpop.xlane.xlu0 %881  ;;  %v884_v1 = vpop.xlane.xlu1 %883 }
 0x25c   :  { %v905_v27 = vmul.f32 -0.5, %v882_v63  ;;  %v906_v50 = vmul.f32 -0.5, %v884_v1 }
 0x25e   :  { %v925_v49 = vsel %vm916_vm1, %v905_v27, 0.0  ;;  %v926_v59 = vsel %vm916_vm1, %v906_v50, 0.0 }
 0x25f   :  { %v886_v0 = vpop.xlane.xlu0 %885  ;;  %v888_v4 = vpop.xlane.xlu1 %887 }
 0x260   :  { %v907_v2 = vmul.f32 -0.5, %v886_v0  ;;  %v908_v9 = vmul.f32 -0.5, %v888_v4 }
 0x262   :  { %v927_v28 = vsel %vm916_vm1, %v907_v2, 0.0  ;;  %v928_v13 = vsel %vm916_vm1, %v908_v9, 0.0 }
 0x263   :  { %v1661_v5 = vpop.xlane.xlu0 %889  ;;  %v1666_v6 = vpop.xlane.xlu1 %891 }
 0x264   :  { %v909_v24 = vmul.f32 -0.5, %v1661_v5  ;;  %v910_v34 = vmul.f32 -0.5, %v1666_v6 }
 0x266   :  { %v929_v42 = vsel %vm916_vm1, %v909_v24, 0.0  ;;  %v930_v62 = vsel %vm916_vm1, %v910_v34, 0.0 }
 0x267   :  { %v1668_v53 = vpop.xlane.xlu0 %893  ;;  %v1674_v12 = vpop.xlane.xlu1 %895 }
 0x268   :  { %v911_v60 = vmul.f32 -0.5, %v1668_v53  ;;  %v912_v1 = vmul.f32 -0.5, %v1674_v12 }
 0x26a   :  { %v931_v63 = vsel %vm916_vm1, %v911_v60, 0.0  ;;  %v932_v6 = vsel %vm916_vm1, %v912_v1, 0.0 }
 0x290   :  { %v774_v14 = vpop.xlane.xlu0 %773 }
 0x291   :  { %v935_v33 = vsel %vm915_vm0, %v774_v14, %v919_v37 }
 0x292   :  { %951 = vst [vmem:[#allocation13 + $0x10] sm:$0xff] %v935_v33 }
 0x294   :  { %v776_v25 = vpop.xlane.xlu1 %775  ;;  %v770_v19 = vpop.xlane.xlu0 %769 }
 0x295   :  { %v936_v7 = vsel %vm915_vm0, %v776_v25, %v920_v16  ;;  %v933_v10 = vsel %vm915_vm0, %v770_v19, %v917_v20 }
 0x296   :  { %952 = vst [vmem:[#allocation13 + $0x18] sm:$0xff] %v936_v7  ;;  %949 = vst [vmem:[#allocation13] sm:$0xff] %v933_v10 }
 0x298   :  { %v772_v26 = vpop.xlane.xlu1 %771 }
 0x299   :  { %v934_v52 = vsel %vm915_vm0, %v772_v26, %v918_v55 }
 0x29a   :  { %950 = vst [vmem:[#allocation13 + $0x8] sm:$0xff] %v934_v52 }
 0x2a0   :  { %v782_v31 = vpop.xlane.xlu0 %781 }
 0x2a1   :  { %v939_v32 = vsel %vm915_vm0, %v782_v31, %v923_v56 }
 0x2a2   :  { %955 = vst [vmem:[#allocation13 + $0x30] sm:$0xff] %v939_v32 }
 0x2a4   :  { %v784_v48 = vpop.xlane.xlu1 %783  ;;  %v778_v22 = vpop.xlane.xlu0 %777 }
 0x2a5   :  { %v940_v38 = vsel %vm915_vm0, %v784_v48, %v924_v40  ;;  %v937_v43 = vsel %vm915_vm0, %v778_v22, %v921_v3 }
 0x2a6   :  { %956 = vst [vmem:[#allocation13 + $0x38] sm:$0xff] %v940_v38  ;;  %953 = vst [vmem:[#allocation13 + $0x20] sm:$0xff] %v937_v43 }
 0x2a8   :  { %v780_v21 = vpop.xlane.xlu1 %779 }
 0x2a9   :  { %v938_v45 = vsel %vm915_vm0, %v780_v21, %v922_v44 }
 0x2aa   :  { %954 = vst [vmem:[#allocation13 + $0x28] sm:$0xff] %v938_v45 }
 0x2af   :  { %v790_v41 = vpop.xlane.xlu0 %789 }
 0x2b0   :  { %v943_v39 = vsel %vm915_vm0, %v790_v41, %v927_v28 }
 0x2b1   :  { %959 = vst [vmem:[#allocation13 + $0x50] sm:$0xff] %v943_v39 }
 0x2b3   :  { %v792_v11 = vpop.xlane.xlu1 %791  ;;  %v786_v51 = vpop.xlane.xlu0 %785 }
 0x2b4   :  { %v944_v54 = vsel %vm915_vm0, %v792_v11, %v928_v13  ;;  %v941_v57 = vsel %vm915_vm0, %v786_v51, %v925_v49 }
 0x2b5   :  { %960 = vst [vmem:[#allocation13 + $0x58] sm:$0xff] %v944_v54  ;;  %957 = vst [vmem:[#allocation13 + $0x40] sm:$0xff] %v941_v57 }
 0x2b7   :  { %v788_v18 = vpop.xlane.xlu1 %787 }
 0x2b8   :  { %v942_v23 = vsel %vm915_vm0, %v788_v18, %v926_v59 }
 0x2b9   :  { %958 = vst [vmem:[#allocation13 + $0x48] sm:$0xff] %v942_v23 }
 0x2c1   :  { %v794_v58 = vpop.xlane.xlu0 %793 }
 0x2c2   :  { %v945_v17 = vsel %vm915_vm0, %v794_v58, %v929_v42 }
 0x2c3   :  { %961 = vst [vmem:[#allocation13 + $0x60] sm:$0xff] %v945_v17 }
 0x2c5   :  { %v796_v0 = vpop.xlane.xlu1 %795  ;;  %v798_v4 = vpop.xlane.xlu0 %797 }
 0x2c6   :  { %v946_v5 = vsel %vm915_vm0, %v796_v0, %v930_v62  ;;  %v947_v46 = vsel %vm915_vm0, %v798_v4, %v931_v63 }
 0x2c7   :  { %962 = vst [vmem:[#allocation13 + $0x68] sm:$0xff] %v946_v5  ;;  %963 = vst [vmem:[#allocation13 + $0x70] sm:$0xff] %v947_v46 }
 0x2c9   :  { %v800_v53 = vpop.xlane.xlu1 %799 }
 0x2ca   :  { %v948_v61 = vsel %vm915_vm0, %v800_v53, %v932_v6 }
 0x2cb   :  { %964 = vst [vmem:[#allocation13 + $0x78] sm:$0xff] %v948_v61 }
 0x2cc   :  { %1321 = shalt.err (!%p1318_p6)
}
 0x2cd   :  { %1000 = dma.vmem_to_hbm [thread:$0]  %s995_s7, 2048, %s1756_s8, [#allocation12], %s1341_s30, %s1341_s30, %s1342_s9  }
 0x2ce   :  { %1336 = dma.done.wait [#allocation4], 6144  }
 0x2cf   :  { %1337 = vsyncadd [#allocation4], 4294961152 }
 0x2d0   :  { %1338 = dma.done.wait [#allocation12], 4096  }
 0x2d1   :  { %1339 = vsyncadd [#allocation12], 4294963200 }
 0x2d2   :  { %1010 = vsyncpa [#allocation3], 1 }
 0x2d3   :  { %1011 = vsyncpa [#allocation6], 1 }
 0x2d4   :  { %1012 = vsyncpa [#allocation9], 1 }
 0x2d5   :  { %1013 = vsyncpa [#allocation4], 1 }
 0x2d6   :  { %1014 = vsyncpa [#allocation12], 1 }

</bundles_post_ra>
